<compile_context>
chip_gen: v7x
topology: tpu7x:2x2x1
jax: 0.10.0
libtpu: 0.0.40
codegen_flags: <defaults>
</compile_context>

<pallas_src>
import math
import functools

import jax
import jax.numpy as jnp
from jax.experimental import pallas as pl
from jax.experimental.pallas import tpu as pltpu


def support_kernel(x_ref, w_ref, s_ref):
    # support = x @ w, computed once per row tile (weight padded to a
    # lane-dense (Fin, Fp) so the result / stores are unmasked).
    s_ref[...] = jnp.dot(
        x_ref[...], w_ref[...], preferred_element_type=jnp.float32
    ).astype(s_ref.dtype)


def aggregate_kernel(adj_ref, s_ref, b_ref, o_ref, acc_ref):
    # output = adj @ support + bias.  The adj-column (contraction) axis is the
    # last grid axis ('arbitrary'): accumulate into a float32 VMEM scratch,
    # add bias and store on the final contraction step.
    k = pl.program_id(1)

    @pl.when(k == 0)
    def _():
        acc_ref[...] = jnp.zeros_like(acc_ref)

    acc_ref[...] += jnp.dot(
        adj_ref[...], s_ref[...], preferred_element_type=jnp.float32
    )

    @pl.when(k == pl.num_programs(1) - 1)
    def _():
        o_ref[...] = (acc_ref[...] + b_ref[...]).astype(o_ref.dtype)


@functools.partial(jax.jit, static_argnames=("row_tile", "k_tile", "f_out"))
def _gcn_forward(x, adj, w_pad, b_pad, *, row_tile, k_tile, f_out):
    N, f_in = x.shape
    fp = w_pad.shape[1]  # padded out_features (multiple of 128)

    # Stage 1: support = x @ w  (one pass over x and w, lane-dense output).
    support = pl.pallas_call(
        support_kernel,
        out_shape=jax.ShapeDtypeStruct((N, fp), x.dtype),
        grid_spec=pltpu.PrefetchScalarGridSpec(
            num_scalar_prefetch=0,
            grid=(N // row_tile,),
            in_specs=[
                pl.BlockSpec((row_tile, f_in), lambda i: (i, 0)),  # x row tile
                pl.BlockSpec((f_in, fp), lambda i: (0, 0)),        # full weight
            ],
            out_specs=pl.BlockSpec((row_tile, fp), lambda i: (i, 0)),
        ),
        compiler_params=pltpu.CompilerParams(
            dimension_semantics=("parallel",)
        ),
    )(x, w_pad)

    # Stage 2: out = adj @ support + bias, contraction tiled + f32 accumulator.
    out_pad = pl.pallas_call(
        aggregate_kernel,
        out_shape=jax.ShapeDtypeStruct((N, fp), x.dtype),
        grid_spec=pltpu.PrefetchScalarGridSpec(
            num_scalar_prefetch=0,
            grid=(N // row_tile, N // k_tile),
            in_specs=[
                pl.BlockSpec((row_tile, k_tile), lambda i, k: (i, k)),  # adj tile
                pl.BlockSpec((k_tile, fp), lambda i, k: (k, 0)),        # support tile
                pl.BlockSpec((1, fp), lambda i, k: (0, 0)),             # bias
            ],
            out_specs=pl.BlockSpec((row_tile, fp), lambda i, k: (i, 0)),
            scratch_shapes=[pltpu.VMEM((row_tile, fp), jnp.float32)],
        ),
        compiler_params=pltpu.CompilerParams(
            dimension_semantics=("parallel", "arbitrary")
        ),
    )(adj, support, b_pad)

    # Strip the lane padding back to the true out_features.
    return out_pad[:, :f_out]


def graph_convolution(x, adj, weight, bias=None, *, row_tile=None, k_tile=None):
    N, f_in = x.shape
    f_out = weight.shape[1]

    # Lane-dense output: pad out_features up to a multiple of 128.
    fp = max(128, ((f_out + 127) // 128) * 128)

    # Big row tiles to fill the MXU / amortize per-step overhead; contraction
    # tiled so the per-step adj working set stays bounded for large N.
    if row_tile is None:
        row_tile = min(256, N)
    if k_tile is None:
        k_tile = min(512, N)
    assert N % row_tile == 0, "N must be divisible by row_tile"
    assert N % k_tile == 0, "N must be divisible by k_tile"

    w_pad = jnp.zeros((f_in, fp), dtype=weight.dtype).at[:, :f_out].set(weight)
    if bias is None:
        b_pad = jnp.zeros((1, fp), dtype=x.dtype)
    else:
        b_pad = jnp.zeros((1, fp), dtype=bias.dtype).at[0, :f_out].set(bias)

    # TODO(synk): a true sparse (CSR/gather) adjacency formulation is out of
    # scope; adj is treated as a dense matrix (torch.spmm with dense output).
    return _gcn_forward(
        x, adj, w_pad, b_pad, row_tile=row_tile, k_tile=k_tile, f_out=f_out
    )


def reference(x, adj, weight, bias):
    return adj @ (x @ weight) + bias[None, :]


if __name__ == "__main__":
    # Small, TPU-friendly shapes: N nodes = 128, in_features = 64, out_features = 32.
    N, F_IN, F_OUT = 128, 64, 32

    key = jax.random.PRNGKey(0)
    k_x, k_adj, k_w, k_b = jax.random.split(key, 4)

    # Node feature matrix.
    x = jax.random.normal(k_x, (N, F_IN), dtype=jnp.float32)

    # Dense, row-normalized random adjacency (plays the role of the sparse adj).
    a = (jax.random.uniform(k_adj, (N, N)) < 0.1).astype(jnp.float32)
    a = a + jnp.eye(N, dtype=jnp.float32)                      # self loops
    adj = a / jnp.sum(a, axis=1, keepdims=True)                # row normalize

    # Deterministic parameter init, matching reset_parameters():
    # uniform(-stdv, stdv) with stdv = 1 / sqrt(out_features).
    stdv = 1.0 / math.sqrt(F_OUT)
    weight = jax.random.uniform(k_w, (F_IN, F_OUT), minval=-stdv, maxval=stdv,
                                dtype=jnp.float32)
    bias = jax.random.uniform(k_b, (F_OUT,), minval=-stdv, maxval=stdv,
                              dtype=jnp.float32)

    out = graph_convolution(x, adj, weight, bias)
    out = jax.block_until_ready(out)

    ref = reference(x, adj, weight, bias)
    assert out.shape == (N, F_OUT)
    assert jnp.allclose(out, ref, atol=1e-4, rtol=1e-4), "mismatch vs reference"

    print("KERNEL_OK")
</pallas_src>

<mosaic_0001>
module attributes {stable_mosaic.version = 11 : i64} {
  func.func @aggregate_kernel(%arg0: i32, %arg1: i32, %arg2: memref<128x128xf32, #tpu.memory_space<vmem>>, %arg3: memref<128x128xf32, #tpu.memory_space<vmem>>, %arg4: memref<1x128xf32, #tpu.memory_space<vmem>>, %arg5: memref<128x128xf32, #tpu.memory_space<vmem>>, %arg6: memref<128x128xf32, #tpu.memory_space<vmem>>) attributes {dimension_semantics = [#tpu.dimension_semantics<parallel>, #tpu.dimension_semantics<arbitrary>], iteration_bounds = array<i64: 1, 1>, scalar_prefetch = 0 : i64, scratch_operands = 1 : i64, tpu.core_type = #tpu.core_type<tc>, window_params = [{transform_indices = @transform_0, window_bounds = array<i64: 128, 128>}, {transform_indices = @transform_1, window_bounds = array<i64: 128, 128>}, {pipeline_mode = #tpu.pipeline_mode<synchronous>, transform_indices = @transform_2, window_bounds = array<i64: 1, 128>}, {transform_indices = @transform_3, window_bounds = array<i64: 128, 128>}]} {
    %c0_i32 = arith.constant 0 : i32
    %0 = arith.cmpi eq, %arg1, %c0_i32 : i32
    %1 = arith.extui %0 : i1 to i32
    %c0_i32_0 = arith.constant 0 : i32
    %2 = arith.cmpi ne, %1, %c0_i32_0 : i32
    scf.if %2 {
      %cst_10 = arith.constant 0.000000e+00 : f32
      %12 = vector.broadcast %cst_10 : f32 to vector<128x128xf32>
      %c0_11 = arith.constant 0 : index
      %c0_12 = arith.constant 0 : index
      %13 = vector.load %arg6[%c0_11, %c0_12] : memref<128x128xf32, #tpu.memory_space<vmem>>, vector<128x128xf32>
      tpu.vector_store %arg6[%c0_11, %c0_12], %12 {strides = array<i32>} : memref<128x128xf32, #tpu.memory_space<vmem>>, vector<128x128xf32>,
    } else {
    }
    %c0 = arith.constant 0 : index
    %c0_1 = arith.constant 0 : index
    %3 = vector.load %arg6[%c0, %c0_1] : memref<128x128xf32, #tpu.memory_space<vmem>>, vector<128x128xf32>
    %c0_2 = arith.constant 0 : index
    %c0_3 = arith.constant 0 : index
    %4 = vector.load %arg2[%c0_2, %c0_3] : memref<128x128xf32, #tpu.memory_space<vmem>>, vector<128x128xf32>
    %c0_4 = arith.constant 0 : index
    %c0_5 = arith.constant 0 : index
    %5 = vector.load %arg3[%c0_4, %c0_5] : memref<128x128xf32, #tpu.memory_space<vmem>>, vector<128x128xf32>
    %cst = arith.constant dense<0.000000e+00> : vector<128x128xf32>
    %6 = tpu.matmul %4, %5, %cst {dimension_numbers = #tpu.dot_dimension_numbers<[1], [0], [0], [1], [0, 0, 1, 1], [], []>} : vector<128x128xf32>, vector<128x128xf32>, vector<128x128xf32> -> vector<128x128xf32>
    %7 = arith.addf %3, %6 : vector<128x128xf32>
    %c0_6 = arith.constant 0 : index
    %c0_7 = arith.constant 0 : index
    %8 = vector.load %arg6[%c0_6, %c0_7] : memref<128x128xf32, #tpu.memory_space<vmem>>, vector<128x128xf32>
    tpu.vector_store %arg6[%c0_6, %c0_7], %7 {strides = array<i32>} : memref<128x128xf32, #tpu.memory_space<vmem>>, vector<128x128xf32>,
    %c0_i32_8 = arith.constant 0 : i32
    %9 = arith.cmpi eq, %arg1, %c0_i32_8 : i32
    %10 = arith.extui %9 : i1 to i32
    %c0_i32_9 = arith.constant 0 : i32
    %11 = arith.cmpi ne, %10, %c0_i32_9 : i32
    scf.if %11 {
      %c0_10 = arith.constant 0 : index
      %c0_11 = arith.constant 0 : index
      %12 = vector.load %arg6[%c0_10, %c0_11] : memref<128x128xf32, #tpu.memory_space<vmem>>, vector<128x128xf32>
      %c0_12 = arith.constant 0 : index
      %c0_13 = arith.constant 0 : index
      %13 = vector.load %arg4[%c0_12, %c0_13] : memref<1x128xf32, #tpu.memory_space<vmem>>, vector<1x128xf32>
      %14 = vector.broadcast %13 : vector<1x128xf32> to vector<128x128xf32>
      %15 = arith.addf %12, %14 : vector<128x128xf32>
      %c0_14 = arith.constant 0 : index
      %c0_15 = arith.constant 0 : index
      %16 = vector.load %arg5[%c0_14, %c0_15] : memref<128x128xf32, #tpu.memory_space<vmem>>, vector<128x128xf32>
      tpu.vector_store %arg5[%c0_14, %c0_15], %15 {strides = array<i32>} : memref<128x128xf32, #tpu.memory_space<vmem>>, vector<128x128xf32>,
    } else {
    }
    return
  }
  func.func @transform_0(%arg0: i32, %arg1: i32) -> (i32, i32) {
    %c0_i32 = arith.constant 0 : i32
    return %arg0, %arg1 : i32, i32
  }
  func.func @transform_1(%arg0: i32, %arg1: i32) -> (i32, i32) {
    %c0_i32 = arith.constant 0 : i32
    %c0_i32_0 = arith.constant 0 : i32
    return %arg1, %c0_i32 : i32, i32
  }
  func.func @transform_2(%arg0: i32, %arg1: i32) -> (i32, i32) {
    %c0_i32 = arith.constant 0 : i32
    %c0_i32_0 = arith.constant 0 : i32
    %c0_i32_1 = arith.constant 0 : i32
    return %c0_i32, %c0_i32_0 : i32, i32
  }
  func.func @transform_3(%arg0: i32, %arg1: i32) -> (i32, i32) {
    %c0_i32 = arith.constant 0 : i32
    %c0_i32_0 = arith.constant 0 : i32
    return %arg0, %c0_i32 : i32, i32
  }
}

module attributes {stable_mosaic.version = 11 : i64} {
  func.func @support_kernel(%arg0: i32, %arg1: memref<128x64xf32, #tpu.memory_space<vmem>>, %arg2: memref<64x128xf32, #tpu.memory_space<vmem>>, %arg3: memref<128x128xf32, #tpu.memory_space<vmem>>) attributes {dimension_semantics = [#tpu.dimension_semantics<parallel>], iteration_bounds = array<i64: 1>, scalar_prefetch = 0 : i64, scratch_operands = 0 : i64, tpu.core_type = #tpu.core_type<tc>, window_params = [{transform_indices = @transform_0, window_bounds = array<i64: 128, 64>}, {pipeline_mode = #tpu.pipeline_mode<synchronous>, transform_indices = @transform_1, window_bounds = array<i64: 64, 128>}, {transform_indices = @transform_2, window_bounds = array<i64: 128, 128>}]} {
    %c0 = arith.constant 0 : index
    %c0_0 = arith.constant 0 : index
    %0 = vector.load %arg1[%c0, %c0_0] : memref<128x64xf32, #tpu.memory_space<vmem>>, vector<128x64xf32>
    %c0_1 = arith.constant 0 : index
    %c0_2 = arith.constant 0 : index
    %1 = vector.load %arg2[%c0_1, %c0_2] : memref<64x128xf32, #tpu.memory_space<vmem>>, vector<64x128xf32>
    %cst = arith.constant dense<0.000000e+00> : vector<128x128xf32>
    %2 = tpu.matmul %0, %1, %cst {dimension_numbers = #tpu.dot_dimension_numbers<[1], [0], [0], [1], [0, 0, 1, 1], [], []>} : vector<128x64xf32>, vector<64x128xf32>, vector<128x128xf32> -> vector<128x128xf32>
    %c0_3 = arith.constant 0 : index
    %c0_4 = arith.constant 0 : index
    %3 = vector.load %arg3[%c0_3, %c0_4] : memref<128x128xf32, #tpu.memory_space<vmem>>, vector<128x128xf32>
    tpu.vector_store %arg3[%c0_3, %c0_4], %2 {strides = array<i32>} : memref<128x128xf32, #tpu.memory_space<vmem>>, vector<128x128xf32>,
    return
  }
  func.func @transform_0(%arg0: i32) -> (i32, i32) {
    %c0_i32 = arith.constant 0 : i32
    %c0_i32_0 = arith.constant 0 : i32
    return %arg0, %c0_i32 : i32, i32
  }
  func.func @transform_1(%arg0: i32) -> (i32, i32) {
    %c0_i32 = arith.constant 0 : i32
    %c0_i32_0 = arith.constant 0 : i32
    %c0_i32_1 = arith.constant 0 : i32
    return %c0_i32, %c0_i32_0 : i32, i32
  }
  func.func @transform_2(%arg0: i32) -> (i32, i32) {
    %c0_i32 = arith.constant 0 : i32
    %c0_i32_0 = arith.constant 0 : i32
    return %arg0, %c0_i32 : i32, i32
  }
}

</mosaic_0001>

<bundles_post_ra>
// kernel: _gcn_forward.3
= control target key start
LH: loop header
LB: loop body
LE: loop exit
PB: predicated region body
PF: predicated region fallthrough
CT: control target
= control target key end

     0   :  { %s625_s1 = inlined_call_operand.vmem [shape: f32[128,128], index: 1, kind: input, shape index: {}]   ;;  %s626_s0 = inlined_call_operand.vmem [shape: f32[128,128], index: 0, kind: input, shape index: {}]   ;;  %s627_s2 = inlined_call_operand.vmem [shape: f32[1,128], index: 2, kind: input, shape index: {}]   ;;  %s628_s3 = inlined_call_operand.vmem [shape: f32[128,128], index: 3, kind: output, shape index: {}]  }
   0x1   :  { %v66_v0 = vld [vmem:[%s625_s1] sm:$0xff]  ;;  %v67_v1 = vld [vmem:[%s625_s1 + $0x8] sm:$0xff]  ;;  %v68_v2 = vld [vmem:[%s625_s1 + $0x10] sm:$0xff] }
   0x2   :  { %v410_v3 = vpack.c.bf16 %v67_v1, %v66_v0  ;;  %v69_v4 = vld [vmem:[%s625_s1 + $0x18] sm:$0xff]  ;;  %v70_v6 = vld [vmem:[%s625_s1 + $0x20] sm:$0xff]  ;;  %v71_v7 = vld [vmem:[%s625_s1 + $0x28] sm:$0xff] }
   0x3   :  { %v414_v5 = vpack.c.bf16 %v69_v4, %v68_v2  ;;  %v418_v8 = vpack.c.bf16 %v71_v7, %v70_v6  ;;  %v50_v9 = vld [vmem:[%s626_s0] sm:$0xff]  ;;  %v72_v11 = vld [vmem:[%s625_s1 + $0x30] sm:$0xff]  ;;  %v73_v12 = vld [vmem:[%s625_s1 + $0x38] sm:$0xff] }
   0x4   :  { %411 = vmatprep.subr.bf16.mxu0 %v410_v3  ;;  %442 = vmatprep.subr.bf16.mxu1 %v410_v3  ;;  %v58_v10 = vld [vmem:[%s626_s0 + $0x40] sm:$0xff]  ;;  %v422_v13 = vpack.c.bf16 %v73_v12, %v72_v11  ;;  %v75_v15 = vld [vmem:[%s625_s1 + $0x48] sm:$0xff]  ;;  %v76_v17 = vld [vmem:[%s625_s1 + $0x50] sm:$0xff] }
   0x5   :  { %413 = vmatpush3.bf16.msra.mxu0 %v410_v3  ;;  %450 = vmatpush3.bf16.msra.mxu1 %v410_v3  ;;  %v74_v14 = vld [vmem:[%s625_s1 + $0x40] sm:$0xff]  ;;  %v77_v18 = vld [vmem:[%s625_s1 + $0x58] sm:$0xff]  ;;  %v79_v21 = vld [vmem:[%s625_s1 + $0x68] sm:$0xff] }
   0x6   :  { %415 = vmatprep.subr.bf16.mxu0 %v414_v5  ;;  %443 = vmatprep.subr.bf16.mxu1 %v414_v5  ;;  %v426_v16 = vpack.c.bf16 %v75_v15, %v74_v14  ;;  %v430_v19 = vpack.c.bf16 %v77_v18, %v76_v17  ;;  %v78_v20 = vld [vmem:[%s625_s1 + $0x60] sm:$0xff]  ;;  %v80_v23 = vld [vmem:[%s625_s1 + $0x70] sm:$0xff]  ;;  %v81_v24 = vld [vmem:[%s625_s1 + $0x78] sm:$0xff] }
   0x7   :  { %386 = vmatprep.mubr.f32.mxu0 %v50_v9  ;;  %398 = vmatprep.mubr.f32.mxu1 %v58_v10  ;;  %v434_v22 = vpack.c.bf16 %v79_v21, %v78_v20  ;;  %v438_v25 = vpack.c.bf16 %v81_v24, %v80_v23  ;;  %v51_v26 = vld [vmem:[%s626_s0 + $0x8] sm:$0xff]  ;;  %v52_v28 = vld [vmem:[%s626_s0 + $0x10] sm:$0xff]  ;;  %v53_v30 = vld [vmem:[%s626_s0 + $0x18] sm:$0xff] }
   0x8   :  { %v59_v27 = vld [vmem:[%s626_s0 + $0x48] sm:$0xff]  ;;  %v60_v29 = vld [vmem:[%s626_s0 + $0x50] sm:$0xff]  ;;  %v61_v31 = vld [vmem:[%s626_s0 + $0x58] sm:$0xff] }
   0x9   :  { %417 = vmatpush3.bf16.msra.mxu0 %v414_v5  ;;  %451 = vmatpush3.bf16.msra.mxu1 %v414_v5  ;;  %v54_v32 = vld [vmem:[%s626_s0 + $0x20] sm:$0xff]  ;;  %v55_v34 = vld [vmem:[%s626_s0 + $0x28] sm:$0xff]  ;;  %v56_v36 = vld [vmem:[%s626_s0 + $0x30] sm:$0xff] }
   0xa   :  { %419 = vmatprep.subr.bf16.mxu0 %v418_v8  ;;  %444 = vmatprep.subr.bf16.mxu1 %v418_v8  ;;  %v62_v33 = vld [vmem:[%s626_s0 + $0x60] sm:$0xff]  ;;  %v63_v35 = vld [vmem:[%s626_s0 + $0x68] sm:$0xff]  ;;  %v64_v37 = vld [vmem:[%s626_s0 + $0x70] sm:$0xff] }
   0xb   :  { %v57_v38 = vld [vmem:[%s626_s0 + $0x38] sm:$0xff]  ;;  %v321_v40 = vld [vmem:[%s627_s2] ss:$0 sm:$0xff] }
   0xc   :  { %v65_v39 = vld [vmem:[%s626_s0 + $0x78] sm:$0xff] }
   0xd   :  { %421 = vmatpush3.bf16.msra.mxu0 %v418_v8  ;;  %452 = vmatpush3.bf16.msra.mxu1 %v418_v8 }
   0xe   :  { %423 = vmatprep.subr.bf16.mxu0 %v422_v13  ;;  %445 = vmatprep.subr.bf16.mxu1 %v422_v13 }
  0x11   :  { %425 = vmatpush3.bf16.msra.mxu0 %v422_v13  ;;  %453 = vmatpush3.bf16.msra.mxu1 %v422_v13 }
  0x12   :  { %427 = vmatprep.subr.bf16.mxu0 %v426_v16  ;;  %446 = vmatprep.subr.bf16.mxu1 %v426_v16 }
  0x15   :  { %429 = vmatpush3.bf16.msra.mxu0 %v426_v16  ;;  %454 = vmatpush3.bf16.msra.mxu1 %v426_v16 }
  0x16   :  { %431 = vmatprep.subr.bf16.mxu0 %v430_v19  ;;  %447 = vmatprep.subr.bf16.mxu1 %v430_v19 }
  0x19   :  { %433 = vmatpush3.bf16.msra.mxu0 %v430_v19  ;;  %455 = vmatpush3.bf16.msra.mxu1 %v430_v19 }
  0x1a   :  { %435 = vmatprep.subr.bf16.mxu0 %v434_v22  ;;  %448 = vmatprep.subr.bf16.mxu1 %v434_v22 }
  0x1d   :  { %437 = vmatpush3.bf16.msra.mxu0 %v434_v22  ;;  %456 = vmatpush3.bf16.msra.mxu1 %v434_v22 }
  0x1e   :  { %439 = vmatprep.subr.bf16.mxu0 %v438_v25  ;;  %449 = vmatprep.subr.bf16.mxu1 %v438_v25 }
  0x21   :  { %441 = vmatpush3.bf16.msra.mxu0 %v438_v25  ;;  %457 = vmatpush3.bf16.msra.mxu1 %v438_v25 }
  0x24   :  { %387 = vmatmul.mubr.f32.vlgmr.msra.gmra.mrb[0].mxu0 %v51_v26  ;;  %399 = vmatmul.mubr.f32.vlgmr.msra.gmra.mrb[0].mxu1 %v59_v27 }
  0x25   :  { %389 = vmatprep.mubr.f32.mxu0 %v52_v28  ;;  %401 = vmatprep.mubr.f32.mxu1 %v60_v29 }
  0x28   :  { %390 = vmatmul.mubr.f32.gmra.mrb[2].mxu0 %v53_v30  ;;  %402 = vmatmul.mubr.f32.gmra.mrb[2].mxu1 %v61_v31 }
  0x29   :  { %392 = vmatprep.mubr.f32.mxu0 %v54_v32  ;;  %404 = vmatprep.mubr.f32.mxu1 %v62_v33 }
  0x2c   :  { %393 = vmatmul.mubr.f32.gmra.mrb[4].mxu0 %v55_v34  ;;  %405 = vmatmul.mubr.f32.gmra.mrb[4].mxu1 %v63_v35 }
  0x2d   :  { %395 = vmatprep.mubr.f32.mxu0 %v56_v36  ;;  %407 = vmatprep.mubr.f32.mxu1 %v64_v37 }
  0x30   :  { %396 = vmatmul.mubr.f32.gmra.mrb[6].mxu0 %v57_v38  ;;  %408 = vmatmul.mubr.f32.gmra.mrb[6].mxu1 %v65_v39 }
  0xf7   :  { %v388_v41 = vpop.f32.mrb[0].mxu0  ;;  %v400_v42 = vpop.f32.mrb[0].mxu1 }
  0xf8   :  { %v286_v43 = vadd.f32 %v388_v41, %v321_v40  ;;  %v294_v44 = vadd.f32 %v400_v42, %v321_v40  ;;  %v148_v45 = vpop.f32.mrb[1].mxu0  ;;  %v188_v46 = vpop.f32.mrb[1].mxu1 }
  0xf9   :  { %v285_v47 = vadd.f32 %v321_v40, %v148_v45  ;;  %v293_v48 = vadd.f32 %v321_v40, %v188_v46 }
  0xfa   :  { %302 = vst [vmem:[%s628_s3 + $0x8] sm:$0xff] %v286_v43  ;;  %310 = vst [vmem:[%s628_s3 + $0x48] sm:$0xff] %v294_v44 }
  0xfb   :  { %301 = vst [vmem:[%s628_s3] sm:$0xff] %v285_v47  ;;  %309 = vst [vmem:[%s628_s3 + $0x40] sm:$0xff] %v293_v48  ;;  %v391_v49 = vpop.f32.mrb[2].mxu0  ;;  %v403_v50 = vpop.f32.mrb[2].mxu1 }
  0xfc   :  { %v288_v51 = vadd.f32 %v391_v49, %v321_v40  ;;  %v296_v52 = vadd.f32 %v403_v50, %v321_v40  ;;  %v158_v53 = vpop.f32.mrb[3].mxu0  ;;  %v198_v54 = vpop.f32.mrb[3].mxu1 }
  0xfd   :  { %v287_v55 = vadd.f32 %v321_v40, %v158_v53  ;;  %v295_v56 = vadd.f32 %v321_v40, %v198_v54 }
  0xfe   :  { %304 = vst [vmem:[%s628_s3 + $0x18] sm:$0xff] %v288_v51  ;;  %312 = vst [vmem:[%s628_s3 + $0x58] sm:$0xff] %v296_v52 }
  0xff   :  { %303 = vst [vmem:[%s628_s3 + $0x10] sm:$0xff] %v287_v55  ;;  %311 = vst [vmem:[%s628_s3 + $0x50] sm:$0xff] %v295_v56  ;;  %v394_v57 = vpop.f32.mrb[4].mxu0  ;;  %v406_v58 = vpop.f32.mrb[4].mxu1 }
 0x100   :  { %v290_v59 = vadd.f32 %v394_v57, %v321_v40  ;;  %v298_v60 = vadd.f32 %v406_v58, %v321_v40  ;;  %v168_v61 = vpop.f32.mrb[5].mxu0  ;;  %v208_v62 = vpop.f32.mrb[5].mxu1 }
 0x101   :  { %v289_v63 = vadd.f32 %v321_v40, %v168_v61  ;;  %v297_v0 = vadd.f32 %v321_v40, %v208_v62 }
 0x102   :  { %306 = vst [vmem:[%s628_s3 + $0x28] sm:$0xff] %v290_v59  ;;  %314 = vst [vmem:[%s628_s3 + $0x68] sm:$0xff] %v298_v60 }
 0x103   :  { %305 = vst [vmem:[%s628_s3 + $0x20] sm:$0xff] %v289_v63  ;;  %313 = vst [vmem:[%s628_s3 + $0x60] sm:$0xff] %v297_v0  ;;  %v397_v1 = vpop.f32.mrb[6].mxu0  ;;  %v409_v2 = vpop.f32.mrb[6].mxu1 }
 0x104   :  { %v292_v3 = vadd.f32 %v397_v1, %v321_v40  ;;  %v300_v4 = vadd.f32 %v409_v2, %v321_v40  ;;  %v178_v5 = vpop.f32.mrb[7].mxu0  ;;  %v218_v6 = vpop.f32.mrb[7].mxu1 }
 0x105   :  { %v291_v7 = vadd.f32 %v321_v40, %v178_v5  ;;  %v299_v8 = vadd.f32 %v321_v40, %v218_v6 }
 0x106   :  { %308 = vst [vmem:[%s628_s3 + $0x38] sm:$0xff] %v292_v3  ;;  %316 = vst [vmem:[%s628_s3 + $0x78] sm:$0xff] %v300_v4 }
 0x107   :  { %307 = vst [vmem:[%s628_s3 + $0x30] sm:$0xff] %v291_v7  ;;  %315 = vst [vmem:[%s628_s3 + $0x70] sm:$0xff] %v299_v8 }

// kernel: _gcn_forward.2
= control target key start
LH: loop header
LB: loop body
LE: loop exit
PB: predicated region body
PF: predicated region fallthrough
CT: control target
= control target key end

     0   :  { %vm35_vm0 = vcmask 523264   ;;  %s504_s1 = inlined_call_operand.vmem [shape: f32[64,128], index: 1, kind: input, shape index: {}]   ;;  %s505_s0 = inlined_call_operand.vmem [shape: f32[128,64], index: 0, kind: input, shape index: {}]   ;;  %s506_s2 = inlined_call_operand.vmem [shape: f32[128,128], index: 2, kind: output, shape index: {}]  }
   0x1   :  { %v27_v0 = vld [vmem:[%s504_s1] sm:$0xff]  ;;  %v28_v1 = vld [vmem:[%s504_s1 + $0x8] sm:$0xff]  ;;  %v29_v2 = vld [vmem:[%s504_s1 + $0x10] sm:$0xff] }
   0x2   :  { %v329_v3 = vpack.c.bf16 %v28_v1, %v27_v0  ;;  %v30_v4 = vld [vmem:[%s504_s1 + $0x18] sm:$0xff]  ;;  %v31_v6 = vld [vmem:[%s504_s1 + $0x20] sm:$0xff]  ;;  %v32_v7 = vld [vmem:[%s504_s1 + $0x28] sm:$0xff] }
   0x3   :  { %v333_v5 = vpack.c.bf16 %v30_v4, %v29_v2  ;;  %v11_v8 = vld [vmem:[%s505_s0] sm:$0xff]  ;;  %v337_v10 = vpack.c.bf16 %v32_v7, %v31_v6  ;;  %v33_v11 = vld [vmem:[%s504_s1 + $0x30] sm:$0xff]  ;;  %v34_v12 = vld [vmem:[%s504_s1 + $0x38] sm:$0xff] }
   0x4   :  { %330 = vmatprep.subr.bf16.mxu0 %v329_v3  ;;  %345 = vmatprep.subr.bf16.mxu1 %v329_v3  ;;  %v19_v9 = vld [vmem:[%s505_s0 + $0x40] sm:$0xff]  ;;  %v341_v13 = vpack.c.bf16 %v34_v12, %v33_v11  ;;  %v12_v14 = vld [vmem:[%s505_s0 + $0x8] sm:$0xff]  ;;  %v13_v16 = vld [vmem:[%s505_s0 + $0x10] sm:$0xff] }
   0x5   :  { %332 = vmatpush3.bf16.msra.mxu0 %v329_v3  ;;  %349 = vmatpush3.bf16.msra.mxu1 %v329_v3  ;;  %v20_v15 = vld [vmem:[%s505_s0 + $0x48] sm:$0xff]  ;;  %v21_v17 = vld [vmem:[%s505_s0 + $0x50] sm:$0xff]  ;;  %v14_v18 = vld [vmem:[%s505_s0 + $0x18] sm:$0xff] }
   0x6   :  { %334 = vmatprep.subr.bf16.mxu0 %v333_v5  ;;  %346 = vmatprep.subr.bf16.mxu1 %v333_v5  ;;  %v22_v19 = vld [vmem:[%s505_s0 + $0x58] sm:$0xff]  ;;  %v15_v20 = vld [vmem:[%s505_s0 + $0x20] sm:$0xff]  ;;  %v16_v22 = vld [vmem:[%s505_s0 + $0x28] sm:$0xff] }
   0x7   :  { %305 = vmatprep.mubr.msk.f32.mxu0 %vm35_vm0, %v11_v8  ;;  %317 = vmatprep.mubr.msk.f32.mxu1 %vm35_vm0, %v19_v9  ;;  %v23_v21 = vld [vmem:[%s505_s0 + $0x60] sm:$0xff]  ;;  %v24_v23 = vld [vmem:[%s505_s0 + $0x68] sm:$0xff]  ;;  %v17_v24 = vld [vmem:[%s505_s0 + $0x30] sm:$0xff] }
   0x8   :  { %v25_v25 = vld [vmem:[%s505_s0 + $0x70] sm:$0xff]  ;;  %v18_v26 = vld [vmem:[%s505_s0 + $0x38] sm:$0xff] }
   0x9   :  { %336 = vmatpush3.bf16.msra.mxu0 %v333_v5  ;;  %350 = vmatpush3.bf16.msra.mxu1 %v333_v5  ;;  %v26_v27 = vld [vmem:[%s505_s0 + $0x78] sm:$0xff] }
   0xa   :  { %338 = vmatprep.subr.bf16.mxu0 %v337_v10  ;;  %347 = vmatprep.subr.bf16.mxu1 %v337_v10 }
   0xd   :  { %340 = vmatpush3.bf16.msra.mxu0 %v337_v10  ;;  %351 = vmatpush3.bf16.msra.mxu1 %v337_v10 }
   0xe   :  { %342 = vmatprep.subr.bf16.mxu0 %v341_v13  ;;  %348 = vmatprep.subr.bf16.mxu1 %v341_v13 }
  0x11   :  { %344 = vmatpush3.bf16.msra.mxu0 %v341_v13  ;;  %352 = vmatpush3.bf16.msra.mxu1 %v341_v13 }
  0x14   :  { %306 = vmatmul.mubr.msk.f32.vlgmr.msra.gmra.mrb[0].mxu0 %vm35_vm0, %v12_v14  ;;  %318 = vmatmul.mubr.msk.f32.vlgmr.msra.gmra.mrb[0].mxu1 %vm35_vm0, %v20_v15 }
  0x15   :  { %308 = vmatprep.mubr.msk.f32.mxu0 %vm35_vm0, %v13_v16  ;;  %320 = vmatprep.mubr.msk.f32.mxu1 %vm35_vm0, %v21_v17 }
  0x18   :  { %309 = vmatmul.mubr.msk.f32.gmra.mrb[2].mxu0 %vm35_vm0, %v14_v18  ;;  %321 = vmatmul.mubr.msk.f32.gmra.mrb[2].mxu1 %vm35_vm0, %v22_v19 }
  0x19   :  { %311 = vmatprep.mubr.msk.f32.mxu0 %vm35_vm0, %v15_v20  ;;  %323 = vmatprep.mubr.msk.f32.mxu1 %vm35_vm0, %v23_v21 }
  0x1c   :  { %312 = vmatmul.mubr.msk.f32.gmra.mrb[4].mxu0 %vm35_vm0, %v16_v22  ;;  %324 = vmatmul.mubr.msk.f32.gmra.mrb[4].mxu1 %vm35_vm0, %v24_v23 }
  0x1d   :  { %314 = vmatprep.mubr.msk.f32.mxu0 %vm35_vm0, %v17_v24  ;;  %326 = vmatprep.mubr.msk.f32.mxu1 %vm35_vm0, %v25_v25 }
  0x20   :  { %315 = vmatmul.mubr.msk.f32.gmra.mrb[6].mxu0 %vm35_vm0, %v18_v26  ;;  %327 = vmatmul.mubr.msk.f32.gmra.mrb[6].mxu1 %vm35_vm0, %v26_v27 }
  0xe7   :  { %v307_v28 = vpop.f32.mrb[0].mxu0  ;;  %v319_v29 = vpop.f32.mrb[0].mxu1 }
  0xe8   :  { %230 = vst [vmem:[%s506_s2 + $0x8] sm:$0xff] %v307_v28  ;;  %238 = vst [vmem:[%s506_s2 + $0x48] sm:$0xff] %v319_v29  ;;  %v150_v30 = vpop.f32.mrb[1].mxu0  ;;  %v190_v31 = vpop.f32.mrb[1].mxu1 }
  0xe9   :  { %229 = vst [vmem:[%s506_s2] sm:$0xff] %v150_v30  ;;  %237 = vst [vmem:[%s506_s2 + $0x40] sm:$0xff] %v190_v31 }
  0xeb   :  { %v310_v32 = vpop.f32.mrb[2].mxu0  ;;  %v322_v33 = vpop.f32.mrb[2].mxu1 }
  0xec   :  { %232 = vst [vmem:[%s506_s2 + $0x18] sm:$0xff] %v310_v32  ;;  %240 = vst [vmem:[%s506_s2 + $0x58] sm:$0xff] %v322_v33  ;;  %v160_v34 = vpop.f32.mrb[3].mxu0  ;;  %v200_v35 = vpop.f32.mrb[3].mxu1 }
  0xed   :  { %231 = vst [vmem:[%s506_s2 + $0x10] sm:$0xff] %v160_v34  ;;  %239 = vst [vmem:[%s506_s2 + $0x50] sm:$0xff] %v200_v35 }
  0xef   :  { %v313_v36 = vpop.f32.mrb[4].mxu0  ;;  %v325_v37 = vpop.f32.mrb[4].mxu1 }
  0xf0   :  { %234 = vst [vmem:[%s506_s2 + $0x28] sm:$0xff] %v313_v36  ;;  %242 = vst [vmem:[%s506_s2 + $0x68] sm:$0xff] %v325_v37  ;;  %v170_v38 = vpop.f32.mrb[5].mxu0  ;;  %v210_v39 = vpop.f32.mrb[5].mxu1 }
  0xf1   :  { %233 = vst [vmem:[%s506_s2 + $0x20] sm:$0xff] %v170_v38  ;;  %241 = vst [vmem:[%s506_s2 + $0x60] sm:$0xff] %v210_v39 }
  0xf3   :  { %v316_v40 = vpop.f32.mrb[6].mxu0  ;;  %v328_v41 = vpop.f32.mrb[6].mxu1 }
  0xf4   :  { %236 = vst [vmem:[%s506_s2 + $0x38] sm:$0xff] %v316_v40  ;;  %244 = vst [vmem:[%s506_s2 + $0x78] sm:$0xff] %v328_v41  ;;  %v180_v42 = vpop.f32.mrb[7].mxu0  ;;  %v220_v43 = vpop.f32.mrb[7].mxu1 }
  0xf5   :  { %235 = vst [vmem:[%s506_s2 + $0x30] sm:$0xff] %v180_v42  ;;  %243 = vst [vmem:[%s506_s2 + $0x70] sm:$0xff] %v220_v43 }

</bundles_post_ra>
